<compile_context>
chip_gen: v7x
topology: tpu7x:2x2x1
jax: 0.10.0
libtpu: 0.0.40
codegen_flags: <defaults>
</compile_context>

<pallas_src>
import jax
import jax.numpy as jnp
from jax.experimental import pallas as pl
from jax.experimental.pallas import tpu as pltpu


_LANES = 128
# 2048 rows * 128 lanes * 4 B = 1 MiB per block; with double-buffered inputs
# and output this stays far under the scoped-VMEM limit on v5e/v6e/v7x.
_MAX_TM = 2048


# ----------------------------- Pallas kernels ------------------------------

def _normalize_kernel(x_ref, mean_ref, inv_std_ref, o_ref):
    # (x - mean) * inv_std, elementwise on the VPU; params broadcast over
    # the sublane (row) axis. inv_std = 1/(std + 1e-6) is precomputed.
    o_ref[...] = (x_ref[...] - mean_ref[...]) * inv_std_ref[...]


def _unnormalize_kernel(x_ref, std_ref, mean_ref, o_ref):
    # x * std + mean
    o_ref[...] = x_ref[...] * std_ref[...] + mean_ref[...]


def _affine_pallas_call(kernel, x2d, a_vec, b_vec):
    """Run kernel(x, a, b) elementwise over (rows, cols).

    a_vec / b_vec are (1, cols) per-lane parameter rows broadcast over rows.
    """
    n, d = x2d.shape
    tm = n if n <= _MAX_TM else _MAX_TM     # full-array block when small
    grid = (pl.cdiv(n, tm),)                # ragged tail handled by Pallas
    return pl.pallas_call(
        kernel,
        out_shape=jax.ShapeDtypeStruct((n, d), jnp.float32),
        grid_spec=pltpu.PrefetchScalarGridSpec(
            num_scalar_prefetch=0,
            grid=grid,
            in_specs=[
                pl.BlockSpec((tm, d), lambda i: (i, 0)),  # activation tile
                pl.BlockSpec((1, d), lambda i: (0, 0)),   # param a (broadcast)
                pl.BlockSpec((1, d), lambda i: (0, 0)),   # param b (broadcast)
            ],
            out_specs=pl.BlockSpec((tm, d), lambda i: (i, 0)),
        ),
        compiler_params=pltpu.CompilerParams(
            dimension_semantics=("parallel",)),
    )(x2d, a_vec, b_vec)


def _prepare_lane_packed(x2d, vecs):
    """Pack (n, d) with small d into (n*d/128, 128) lane-dense rows when the
    total element count allows it; tile the per-feature vectors to match."""
    n, d = x2d.shape
    if d < _LANES and _LANES % d == 0 and (n * d) % _LANES == 0:
        reps = _LANES // d
        x_p = x2d.reshape((n * d) // _LANES, _LANES)
        vecs_p = [jnp.tile(v, reps).reshape(1, _LANES) for v in vecs]
        return x_p, vecs_p
    # Fallback: keep (n, d); last block dim equals the full array dim.
    return x2d, [v.reshape(1, d) for v in vecs]


# ------------------------------ Model wrapper ------------------------------

class BaseModelPallas:
    """JAX/Pallas port of BaseModel's normalization compute path."""

    def __init__(self, state_dim: int, action_dim: int):
        self._hp = dict(
            batch_size=-1, max_seq_len=-1, dataset_normalization=True,
            store_normalization_inmodel=True, normalization="batch",
            state_dim=state_dim, action_dim=action_dim,
        )
        if self._hp["dataset_normalization"] and self._hp["store_normalization_inmodel"]:
            self.setup_normalizing_params()
        self.throttle_log_images = 0
        # TODO(synk): load_normalizing_params / _restore_params / _load_weights
        # read pickles/checkpoints from disk; not reproduced (no file IO).

    def setup_normalizing_params(self):
        # Matches nn.Parameter(torch.zeros(...)) in setup_normalizing_params.
        self.states_mean = jnp.zeros((self._hp["state_dim"],), jnp.float32)
        self.states_std = jnp.zeros((self._hp["state_dim"],), jnp.float32)
        self.actions_mean = jnp.zeros((self._hp["action_dim"],), jnp.float32)
        self.actions_std = jnp.zeros((self._hp["action_dim"],), jnp.float32)

    def set_normalizing_params(self, params_dict):
        for k, v in params_dict.items():
            setattr(self, k, jnp.asarray(v, dtype=jnp.float32))

    def _get(self, name):
        return getattr(self, name + "_mean"), getattr(self, name + "_std")

    def _run(self, kernel, tensor, a_vec, b_vec):
        d = tensor.shape[-1]
        lead = tensor.shape[:-1]
        x2d = tensor.reshape(-1, d).astype(jnp.float32)
        x_p, (a_p, b_p) = _prepare_lane_packed(
            x2d, [a_vec.astype(jnp.float32), b_vec.astype(jnp.float32)])
        out = _affine_pallas_call(kernel, x_p, a_p, b_p)
        # Reshape is order-preserving, so unpacking is free (no copies).
        return out.reshape(*lead, d)

    def apply_dataset_normalization(self, tensor, name):
        mean, std = self._get(name)
        # Reciprocal of a tiny (d,) vector, computed once outside the kernel;
        # the kernel body is then a sub + mul (no per-element divide).
        inv_std = 1.0 / (std + 1e-6)
        return self._run(_normalize_kernel, tensor, mean, inv_std)

    def unnormalize_dataset(self, tensor, name):
        mean, std = self._get(name)
        return self._run(_unnormalize_kernel, tensor, std, mean)

    def forward(self, inputs):
        raise NotImplementedError(
            "Need to implement this function in the subclass!")


# --------------------------------- Driver ----------------------------------

if __name__ == "__main__":
    STATE_DIM = 32
    ACTION_DIM = 8
    B, T = 2, 8

    key = jax.random.PRNGKey(0)
    k_s, k_a, k_sm, k_ss, k_am, k_as, k_big = jax.random.split(key, 7)

    states = jax.random.normal(k_s, (B, T, STATE_DIM), jnp.float32)
    actions = jax.random.normal(k_a, (B, T, ACTION_DIM), jnp.float32)

    model = BaseModelPallas(STATE_DIM, ACTION_DIM)
    # Deterministic non-trivial normalization statistics (set via the same API
    # the original module exposes: set_normalizing_params).
    model.set_normalizing_params({
        "states_mean": jax.random.normal(k_sm, (STATE_DIM,)),
        "states_std": jax.random.uniform(k_ss, (STATE_DIM,), minval=0.5, maxval=2.0),
        "actions_mean": jax.random.normal(k_am, (ACTION_DIM,)),
        "actions_std": jax.random.uniform(k_as, (ACTION_DIM,), minval=0.5, maxval=2.0),
    })

    s_norm = model.apply_dataset_normalization(states, "states")
    a_norm = model.apply_dataset_normalization(actions, "actions")
    s_back = model.unnormalize_dataset(s_norm, "states")
    a_back = model.unnormalize_dataset(a_norm, "actions")
    jax.block_until_ready((s_norm, a_norm, s_back, a_back))

    # Reference checks against plain JAX semantics (matches the PyTorch spec).
    s_ref = (states - model.states_mean) / (model.states_std + 1e-6)
    a_ref = (actions - model.actions_mean) / (model.actions_std + 1e-6)
    assert jnp.allclose(s_norm, s_ref, atol=1e-5, rtol=1e-5)
    assert jnp.allclose(a_norm, a_ref, atol=1e-5, rtol=1e-5)
    assert jnp.allclose(s_back, states, atol=1e-4, rtol=1e-4)
    assert jnp.allclose(a_back, actions, atol=1e-4, rtol=1e-4)

    # Medium-size check exercising the multi-block path with a ragged final
    # block (64*130*32 elems -> 2080 packed rows -> grid of 2, no padding).
    states_med = jax.random.normal(k_big, (64, 130, STATE_DIM), jnp.float32)
    sm_norm = model.apply_dataset_normalization(states_med, "states")
    jax.block_until_ready(sm_norm)
    sm_ref = (states_med - model.states_mean) / (model.states_std + 1e-6)
    assert jnp.allclose(sm_norm, sm_ref, atol=1e-5, rtol=1e-5)

    print("KERNEL_OK")
</pallas_src>

<mosaic_0001>
module attributes {stable_mosaic.version = 11 : i64} {
  func.func @_normalize_kernel(%arg0: i32, %arg1: memref<4x128xf32, #tpu.memory_space<vmem>>, %arg2: memref<1x128xf32, #tpu.memory_space<vmem>>, %arg3: memref<1x128xf32, #tpu.memory_space<vmem>>, %arg4: memref<4x128xf32, #tpu.memory_space<vmem>>) attributes {dimension_semantics = [#tpu.dimension_semantics<parallel>], iteration_bounds = array<i64: 1>, scalar_prefetch = 0 : i64, scratch_operands = 0 : i64, tpu.core_type = #tpu.core_type<tc>, window_params = [{transform_indices = @transform_0, window_bounds = array<i64: 4, 128>}, {pipeline_mode = #tpu.pipeline_mode<synchronous>, transform_indices = @transform_1, window_bounds = array<i64: 1, 128>}, {pipeline_mode = #tpu.pipeline_mode<synchronous>, transform_indices = @transform_2, window_bounds = array<i64: 1, 128>}, {transform_indices = @transform_3, window_bounds = array<i64: 4, 128>}]} {
    %c0 = arith.constant 0 : index
    %c0_0 = arith.constant 0 : index
    %0 = vector.load %arg1[%c0, %c0_0] : memref<4x128xf32, #tpu.memory_space<vmem>>, vector<4x128xf32>
    %c0_1 = arith.constant 0 : index
    %c0_2 = arith.constant 0 : index
    %1 = vector.load %arg2[%c0_1, %c0_2] : memref<1x128xf32, #tpu.memory_space<vmem>>, vector<1x128xf32>
    %2 = vector.broadcast %1 : vector<1x128xf32> to vector<4x128xf32>
    %3 = arith.subf %0, %2 : vector<4x128xf32>
    %c0_3 = arith.constant 0 : index
    %c0_4 = arith.constant 0 : index
    %4 = vector.load %arg3[%c0_3, %c0_4] : memref<1x128xf32, #tpu.memory_space<vmem>>, vector<1x128xf32>
    %5 = vector.broadcast %4 : vector<1x128xf32> to vector<4x128xf32>
    %6 = arith.mulf %3, %5 : vector<4x128xf32>
    %c0_5 = arith.constant 0 : index
    %c0_6 = arith.constant 0 : index
    %7 = vector.load %arg4[%c0_5, %c0_6] : memref<4x128xf32, #tpu.memory_space<vmem>>, vector<4x128xf32>
    tpu.vector_store %arg4[%c0_5, %c0_6], %6 {strides = array<i32>} : memref<4x128xf32, #tpu.memory_space<vmem>>, vector<4x128xf32>,
    return
  }
  func.func @transform_0(%arg0: i32) -> (i32, i32) {
    %c0_i32 = arith.constant 0 : i32
    %c0_i32_0 = arith.constant 0 : i32
    return %arg0, %c0_i32 : i32, i32
  }
  func.func @transform_1(%arg0: i32) -> (i32, i32) {
    %c0_i32 = arith.constant 0 : i32
    %c0_i32_0 = arith.constant 0 : i32
    %c0_i32_1 = arith.constant 0 : i32
    return %c0_i32, %c0_i32_0 : i32, i32
  }
  func.func @transform_2(%arg0: i32) -> (i32, i32) {
    %c0_i32 = arith.constant 0 : i32
    %c0_i32_0 = arith.constant 0 : i32
    %c0_i32_1 = arith.constant 0 : i32
    return %c0_i32, %c0_i32_0 : i32, i32
  }
  func.func @transform_3(%arg0: i32) -> (i32, i32) {
    %c0_i32 = arith.constant 0 : i32
    %c0_i32_0 = arith.constant 0 : i32
    return %arg0, %c0_i32 : i32, i32
  }
}

</mosaic_0001>

<bundles_post_ra>
// kernel: tpu_custom_call.1
= control target key start
LH: loop header
LB: loop body
LE: loop exit
PB: predicated region body
PF: predicated region fallthrough
CT: control target
= control target key end

     0   :  { %8 = vsyncpa [#allocation3], 0  ;;  %s164_s0 = inlined_call_operand.hbm [shape: f32[4,128], index: 0, kind: input, shape index: {}]   ;;  %s165_s1 = inlined_call_operand.vmem [shape: f32[1,128], index: 1, kind: input, shape index: {}]   ;;  %s166_s2 = inlined_call_operand.vmem [shape: f32[1,128], index: 2, kind: input, shape index: {}]   ;;  %s167_s3 = inlined_call_operand.hbm [shape: f32[4,128], index: 3, kind: output, shape index: {}]  }
   0x1   :  { %9 = vsyncpa [#allocation4], 0  ;;  %s112_s12 = smov [#allocation2]   ;;  %s64_s16 = scalar_lea.hbm %s164_s0, 64 }
   0x2   :  { %s16_s13 = sshll.u32 %s112_s12, 4  ;;  %p65_p0 = scmp.ne.s32.totalorder %s164_s0, %s64_s16  ;;  %s17_s13 = int_to_ptr.vmem [resolvable:$true] %s16_s13 }
   0x3   :  { %p68_p1 = scmp.lt.u32.totalorder %s64_s16, %s164_s0 }
   0x5   :  { %p70_p2 = pnand %p68_p1, %p65_p0 }
   0x7   :  { %73 = shalt.err (!%p70_p2)
}
   0x8   :  { %s74_s21 = scalar_lea.vmem %s17_s13, 64  ;;  %p79_p4 = scmp.lt.s32.totalorder %s17_s13, %s17_s13 }
   0x9   :  { %p75_p3 = scmp.ne.s32.totalorder %s17_s13, %s74_s21  ;;  %p80_p5 = scmp.lt.s32.totalorder %s74_s21, %s74_s21 }
   0xb   :  { %p81_p6 = por %p80_p5, %p79_p4 }
   0xd   :  { %p82_p7 = pnand %p81_p6, %p75_p3 }
   0xf   :  { %85 = shalt.err (!%p82_p7)
}
  0x10   :  { %19 = dma.hbm_to_vmem [thread:$0]  %s164_s0, 64, %s17_s13, [#allocation3]  }
  0x11   :  { %108 = dma.done.wait [#allocation3], 64  }
  0x12   :  { %109 = vsyncadd [#allocation3], 4294967232  ;;  %s113_s24 = smov [#allocation5]   ;;  %v27_v0 = vld [vmem:[#allocation2] sm:$0xf] }
  0x13   :  { %s51_s25 = sshll.u32 %s113_s24, 4  ;;  %v60_v1 = vld [vmem:[%s165_s1] ss:$0 sm:$0xff]  ;;  %s52_s25 = int_to_ptr.vmem [resolvable:$true] %s51_s25 }
  0x14   :  { %v61_v2 = vld [vmem:[%s166_s2] ss:$0 sm:$0xff]  ;;  %v35_v3 = vsub.f32 %v27_v0, %v60_v1  ;;  %s86_s30 = scalar_lea.vmem %s52_s25, 64  ;;  %p91_p9 = scmp.lt.s32.totalorder %s52_s25, %s52_s25 }
  0x15   :  { %p87_p8 = scmp.ne.s32.totalorder %s52_s25, %s86_s30  ;;  %p92_p10 = scmp.lt.s32.totalorder %s86_s30, %s86_s30 }
  0x16   :  { %v43_v4 = vmul.f32 %v61_v2, %v35_v3 }
  0x17   :  { %p93_p11 = por %p92_p10, %p91_p9 }
  0x18   :  { %44 = vst [vmem:[#allocation5] sm:$0xf] %v43_v4 }
  0x19   :  { %p94_p12 = pnand %p93_p11, %p87_p8 }
  0x1b   :  { %97 = shalt.err (!%p94_p12)
}
  0x1c   :  { %s98_s5 = scalar_lea.hbm %s167_s3, 64 }
  0x1d   :  { %p99_p13 = scmp.ne.s32.totalorder %s167_s3, %s98_s5  ;;  %p102_p0 = scmp.lt.u32.totalorder %s98_s5, %s167_s3 }
  0x1f   :  { %p104_p1 = pnand %p102_p0, %p99_p13 }
  0x21   :  { %107 = shalt.err (!%p104_p1)
}
  0x22   :  { %54 = dma.vmem_to_hbm [thread:$0]  %s52_s25, 64, %s167_s3, [#allocation4]  }
  0x23   :  { %110 = dma.done.wait [#allocation4], 64  }
  0x24   :  { %111 = vsyncadd [#allocation4], 4294967232 }
  0x25   :  { %58 = vsyncpa [#allocation3], 1 }
  0x26   :  { %59 = vsyncpa [#allocation4], 1 }

</bundles_post_ra>
